<compile_context>
chip_gen: v5e
topology: v5e:2x2
jax: 0.10.0
libtpu: 0.0.40
codegen_flags: <defaults>
</compile_context>

<pallas_src>
import functools

import jax
import jax.numpy as jnp
from jax.experimental import pallas as pl
from jax.experimental.pallas import tpu as pltpu


# ---------------- generation-aware tiling for the fc1 GEMV -------------------
def _choose_fc1_tiling(S: int, K: int, D: int, M1: int):
    """Pick the fc1 output-tile width tn and the VMEM limit for this chip."""
    try:
        vmem_cap = int(pltpu.get_tpu_info().vmem_capacity_bytes)
    except Exception:
        vmem_cap = 64 << 20                      # conservative: v7x per-TC VMEM
    vmem_limit = int(0.75 * vmem_cap)            # ~48 MiB on v7x, ~96 MiB on v5e/v6e

    # Per-core VMEM: double-buffered bf16 (S, D, tn) weight block dominates;
    # reserve room for the resident masks block (+pipelining copy) and misc.
    budget = vmem_limit - 8 * S * K * D - (2 << 20)
    candidates = [t for t in (1024, 512, 256, 128) if 4 * S * D * t <= budget]
    if not candidates:
        candidates = [128]
    # Prefer >=4 output tiles so each of (up to) two TensorCores still has a
    # "next" weight tile to prefetch; otherwise just take the biggest fitting tile.
    tn = next((t for t in candidates if pl.cdiv(M1, t) >= 4), candidates[-1])
    return tn, vmem_limit


# -------------- fused pooling + fc1 + bias1 + ReLU Pallas kernel --------------
def _fused_pool_fc1_kernel(masks_ref, w1_ref, b1_ref, o_ref, *, pooling, S):
    # masks_ref: (S, K, D) f32   -- constant block index -> resident in VMEM
    # w1_ref   : (S, D, tn) bf16 -- streamed weight slab for this output tile
    # b1_ref   : (1, tn)  f32
    # o_ref    : (1, tn)  f32
    acc = jnp.zeros(o_ref.shape, jnp.float32)
    for s in range(S):                               # static unroll (S is tiny)
        m = masks_ref[s]                             # (K, D) f32
        if pooling == "average":
            x = jnp.mean(m, axis=0, keepdims=True)
        elif pooling == "max":
            x = jnp.max(m, axis=0, keepdims=True)
        elif pooling == "min":
            x = jnp.min(m, axis=0, keepdims=True)
        else:
            raise ValueError(pooling)
        # bf16 x bf16 MXU matmul, f32 accumulation.
        acc = acc + jnp.dot(x.astype(jnp.bfloat16), w1_ref[s],
                            preferred_element_type=jnp.float32)
    o_ref[...] = jnp.maximum(acc + b1_ref[...], 0.0)  # bias1 + ReLU folded in


def fused_pool_fc1(slice_masks, w1_3d_bf16, b1_row, pooling: str,
                   tn: int, vmem_limit: int):
    """(S,K,D) masks + (S,D,M1p) bf16 weights -> (1, M1p) f32 = relu(fc1(pool(...)))."""
    S, K, D = slice_masks.shape
    M1p = w1_3d_bf16.shape[2]
    assert w1_3d_bf16.shape[:2] == (S, D)
    assert M1p % tn == 0 and tn % 128 == 0
    J = M1p // tn
    kernel = functools.partial(_fused_pool_fc1_kernel, pooling=pooling, S=S)
    return pl.pallas_call(
        kernel,
        out_shape=jax.ShapeDtypeStruct((1, M1p), jnp.float32),
        grid_spec=pltpu.PrefetchScalarGridSpec(
            num_scalar_prefetch=0,
            grid=(J,),                                        # output tiles only
            in_specs=[
                pl.BlockSpec((S, K, D), lambda j: (0, 0, 0)),   # masks (resident)
                pl.BlockSpec((S, D, tn), lambda j: (0, 0, j)),  # fc1 weight slab
                pl.BlockSpec((1, tn), lambda j: (0, j)),        # bias1 tile
            ],
            out_specs=pl.BlockSpec((1, tn), lambda j: (0, j)),
        ),
        compiler_params=pltpu.CompilerParams(
            dimension_semantics=("parallel",),                # shard J on megacore
            vmem_limit_bytes=vmem_limit,
        ),
    )(slice_masks, w1_3d_bf16, b1_row)


# --------------------------------- forward -----------------------------------
@functools.partial(jax.jit, static_argnames=("pooling",))
def volume_estimation_forward(slice_masks, params, pooling="average"):
    """slice_masks: (S, K, D) f32 seg-model outputs per descriptor group.

    Returns shape (M3,) f32, matching torch.flatten(FCBlock(regInput)).
    params = (w1, b1, w2, b2, w3, b3); w1 may already be bf16 (preferred -- in
    production the bandwidth-critical fc1 weight is stored once in bf16).
    """
    S, K, D = slice_masks.shape
    w1, b1, w2, b2, w3, b3 = params
    M1 = w1.shape[1]
    assert w1.shape[0] == S * D

    tn, vmem_limit = _choose_fc1_tiling(S, K, D, M1)
    M1p = pl.cdiv(M1, tn) * tn                       # relaxed: pad to tile multiple

    w1_bf16 = w1 if w1.dtype == jnp.bfloat16 else w1.astype(jnp.bfloat16)
    # (S*D, M1) -> (S, D, M1): splitting the leading axis is a free reshape.
    w1_3d = w1_bf16.reshape(S, D, M1)
    b1_row = b1.reshape(1, M1)
    if M1p != M1:
        # Zero-padded output columns give relu(0 + 0) = 0 and are sliced off below.
        w1_3d = jnp.pad(w1_3d, ((0, 0), (0, 0), (0, M1p - M1)))
        b1_row = jnp.pad(b1_row, ((0, 0), (0, M1p - M1)))

    # Fused pooling + fc1 + bias1 + ReLU (one pallas_call).
    h1 = fused_pool_fc1(slice_masks, w1_3d, b1_row, pooling, tn, vmem_limit)
    h1 = h1[:, :M1]                                  # drop padded columns (no-op here)

    # fc2 + ReLU + fc3: tiny (~8K FLOPs) -> plain jnp inside this jit (no extra
    # kernel dispatch, per perf review).
    h2 = jnp.maximum(h1 @ w2 + b2.reshape(1, -1), 0.0)
    out = h2 @ w3 + b3.reshape(1, -1)
    return out.reshape(-1)                           # torch.flatten


# ------------------------------- references ----------------------------------
def _pool_ref(slice_masks, pooling):
    if pooling == "average":
        return jnp.mean(slice_masks, axis=1)
    elif pooling == "max":
        return jnp.max(slice_masks, axis=1)
    return jnp.min(slice_masks, axis=1)


def _reference_f32(slice_masks, params, pooling="average"):
    w1, b1, w2, b2, w3, b3 = params
    x = _pool_ref(slice_masks, pooling).reshape(-1)   # torch.flatten(descriptors)
    h1 = jnp.maximum(x @ w1 + b1, 0.0)
    h2 = jnp.maximum(h1 @ w2 + b2, 0.0)
    return h2 @ w3 + b3


def _reference_bf16_fc1(slice_masks, params, pooling="average"):
    """Matches the kernel numerics: bf16 fc1 operands, f32 accumulation."""
    w1, b1, w2, b2, w3, b3 = params
    x = _pool_ref(slice_masks, pooling).reshape(1, -1)
    x = x.astype(jnp.bfloat16).astype(jnp.float32)
    w1f = w1.astype(jnp.bfloat16).astype(jnp.float32)
    h1 = jnp.maximum((x @ w1f).reshape(-1) + b1, 0.0)
    h2 = jnp.maximum(h1 @ w2 + b2, 0.0)
    return h2 @ w3 + b3


def init_params(key, S, D, M1, M2=16, M3=2):
    """FCBlock(S*D, M1, M2, M3); PyTorch-style uniform(-1/sqrt(fan_in), +)."""
    ks = jax.random.split(key, 6)

    def lin(kw, kb, fan_in, fan_out):
        bound = 1.0 / jnp.sqrt(fan_in)
        w = jax.random.uniform(kw, (fan_in, fan_out), jnp.float32, -bound, bound)
        b = jax.random.uniform(kb, (fan_out,), jnp.float32, -bound, bound)
        return w, b

    w1, b1 = lin(ks[0], ks[1], S * D, M1)
    w2, b2 = lin(ks[2], ks[3], M1, M2)
    w3, b3 = lin(ks[4], ks[5], M2, M3)
    return (w1, b1, w2, b2, w3, b3)


if __name__ == "__main__":
    # Small, structure-preserving shapes:
    #   useLong=True, 2 short slice groups -> S = numSlices = 3 descriptor groups
    #   K = 8 segmentation masks pooled per group
    #   D = 1024 flattened mask size (stand-in for 9216)
    #   M1 = 512 (!= D, to exercise generalized fc2 shapes), M2=16, M3=2
    S, K, D, M1 = 3, 8, 1024, 512

    key = jax.random.PRNGKey(0)
    k_masks, k_params = jax.random.split(key)

    # Synthetic, deterministic segmentation-model outputs (see TODO above).
    slice_masks = jax.random.uniform(k_masks, (S, K, D), jnp.float32)
    params = init_params(k_params, S, D, M1)

    # Store the bandwidth-critical fc1 weight in bf16 once, up front.
    w1, b1, w2, b2, w3, b3 = params
    params_exec = (w1.astype(jnp.bfloat16), b1, w2, b2, w3, b3)

    out = volume_estimation_forward(slice_masks, params_exec, pooling="average")
    out = jax.block_until_ready(out)

    ref_f32 = _reference_f32(slice_masks, params, pooling="average")
    ref_bf16 = _reference_bf16_fc1(slice_masks, params, pooling="average")

    assert out.shape == (2,)
    # Tight check against a reference mirroring the kernel's bf16-fc1 numerics.
    assert jnp.allclose(out, ref_bf16, rtol=1e-3, atol=1e-3), (out, ref_bf16)
    # Loose sanity check against the full-f32 torch-equivalent reference.
    assert jnp.allclose(out, ref_f32, rtol=5e-2, atol=5e-2), (out, ref_f32)

    print("KERNEL_OK")
</pallas_src>

<mosaic_0001>
module attributes {stable_mosaic.version = 11 : i64} {
  func.func @_fused_pool_fc1_kernel(%arg0: i32, %arg1: memref<3x8x1024xf32, #tpu.memory_space<vmem>>, %arg2: memref<3x1024x128xbf16, #tpu.memory_space<vmem>>, %arg3: memref<1x128xf32, #tpu.memory_space<vmem>>, %arg4: memref<1x128xf32, #tpu.memory_space<vmem>>) attributes {dimension_semantics = [#tpu.dimension_semantics<parallel>], iteration_bounds = array<i64: 4>, scalar_prefetch = 0 : i64, scratch_operands = 0 : i64, tpu.core_type = #tpu.core_type<tc>, window_params = [{pipeline_mode = #tpu.pipeline_mode<synchronous>, transform_indices = @transform_0, window_bounds = array<i64: 3, 8, 1024>}, {transform_indices = @transform_1, window_bounds = array<i64: 3, 1024, 128>}, {transform_indices = @transform_2, window_bounds = array<i64: 1, 128>}, {transform_indices = @transform_3, window_bounds = array<i64: 1, 128>}]} {
    %cst = arith.constant 0.000000e+00 : f32
    %0 = vector.broadcast %cst : f32 to vector<1x128xf32>
    %c0 = arith.constant 0 : index
    %c0_0 = arith.constant 0 : index
    %c0_1 = arith.constant 0 : index
    %1 = vector.load %arg1[%c0, %c0_0, %c0_1] : memref<3x8x1024xf32, #tpu.memory_space<vmem>>, vector<1x8x1024xf32>
    %2 = vector.shape_cast %1 : vector<1x8x1024xf32> to vector<8x1024xf32>
    %cst_2 = arith.constant dense<0.000000e+00> : vector<1024xf32>
    %3 = vector.multi_reduction <add>, %2, %cst_2 [0] : vector<8x1024xf32> to vector<1024xf32>
    %4 = vector.shape_cast %3 : vector<1024xf32> to vector<1x1024xf32>
    %cst_3 = arith.constant 8.000000e+00 : f32
    %5 = vector.broadcast %cst_3 : f32 to vector<1x1024xf32>
    %6 = arith.divf %4, %5 : vector<1x1024xf32>
    %7 = arith.truncf %6 : vector<1x1024xf32> to vector<1x1024xbf16>
    %c0_4 = arith.constant 0 : index
    %c0_5 = arith.constant 0 : index
    %c0_6 = arith.constant 0 : index
    %8 = vector.load %arg2[%c0_4, %c0_5, %c0_6] : memref<3x1024x128xbf16, #tpu.memory_space<vmem>>, vector<1x1024x128xbf16>
    %9 = vector.shape_cast %8 : vector<1x1024x128xbf16> to vector<1024x128xbf16>
    %cst_7 = arith.constant dense<0.000000e+00> : vector<1x128xf32>
    %10 = tpu.matmul %7, %9, %cst_7 {dimension_numbers = #tpu.dot_dimension_numbers<[1], [0], [0], [1], [0, 0, 1, 1], [], []>} : vector<1x1024xbf16>, vector<1024x128xbf16>, vector<1x128xf32> -> vector<1x128xf32>
    %11 = arith.addf %0, %10 : vector<1x128xf32>
    %c1 = arith.constant 1 : index
    %c0_8 = arith.constant 0 : index
    %c0_9 = arith.constant 0 : index
    %12 = vector.load %arg1[%c1, %c0_8, %c0_9] : memref<3x8x1024xf32, #tpu.memory_space<vmem>>, vector<1x8x1024xf32>
    %13 = vector.shape_cast %12 : vector<1x8x1024xf32> to vector<8x1024xf32>
    %cst_10 = arith.constant dense<0.000000e+00> : vector<1024xf32>
    %14 = vector.multi_reduction <add>, %13, %cst_10 [0] : vector<8x1024xf32> to vector<1024xf32>
    %15 = vector.shape_cast %14 : vector<1024xf32> to vector<1x1024xf32>
    %cst_11 = arith.constant 8.000000e+00 : f32
    %16 = vector.broadcast %cst_11 : f32 to vector<1x1024xf32>
    %17 = arith.divf %15, %16 : vector<1x1024xf32>
    %18 = arith.truncf %17 : vector<1x1024xf32> to vector<1x1024xbf16>
    %c1_12 = arith.constant 1 : index
    %c0_13 = arith.constant 0 : index
    %c0_14 = arith.constant 0 : index
    %19 = vector.load %arg2[%c1_12, %c0_13, %c0_14] : memref<3x1024x128xbf16, #tpu.memory_space<vmem>>, vector<1x1024x128xbf16>
    %20 = vector.shape_cast %19 : vector<1x1024x128xbf16> to vector<1024x128xbf16>
    %cst_15 = arith.constant dense<0.000000e+00> : vector<1x128xf32>
    %21 = tpu.matmul %18, %20, %cst_15 {dimension_numbers = #tpu.dot_dimension_numbers<[1], [0], [0], [1], [0, 0, 1, 1], [], []>} : vector<1x1024xbf16>, vector<1024x128xbf16>, vector<1x128xf32> -> vector<1x128xf32>
    %22 = arith.addf %11, %21 : vector<1x128xf32>
    %c2 = arith.constant 2 : index
    %c0_16 = arith.constant 0 : index
    %c0_17 = arith.constant 0 : index
    %23 = vector.load %arg1[%c2, %c0_16, %c0_17] : memref<3x8x1024xf32, #tpu.memory_space<vmem>>, vector<1x8x1024xf32>
    %24 = vector.shape_cast %23 : vector<1x8x1024xf32> to vector<8x1024xf32>
    %cst_18 = arith.constant dense<0.000000e+00> : vector<1024xf32>
    %25 = vector.multi_reduction <add>, %24, %cst_18 [0] : vector<8x1024xf32> to vector<1024xf32>
    %26 = vector.shape_cast %25 : vector<1024xf32> to vector<1x1024xf32>
    %cst_19 = arith.constant 8.000000e+00 : f32
    %27 = vector.broadcast %cst_19 : f32 to vector<1x1024xf32>
    %28 = arith.divf %26, %27 : vector<1x1024xf32>
    %29 = arith.truncf %28 : vector<1x1024xf32> to vector<1x1024xbf16>
    %c2_20 = arith.constant 2 : index
    %c0_21 = arith.constant 0 : index
    %c0_22 = arith.constant 0 : index
    %30 = vector.load %arg2[%c2_20, %c0_21, %c0_22] : memref<3x1024x128xbf16, #tpu.memory_space<vmem>>, vector<1x1024x128xbf16>
    %31 = vector.shape_cast %30 : vector<1x1024x128xbf16> to vector<1024x128xbf16>
    %cst_23 = arith.constant dense<0.000000e+00> : vector<1x128xf32>
    %32 = tpu.matmul %29, %31, %cst_23 {dimension_numbers = #tpu.dot_dimension_numbers<[1], [0], [0], [1], [0, 0, 1, 1], [], []>} : vector<1x1024xbf16>, vector<1024x128xbf16>, vector<1x128xf32> -> vector<1x128xf32>
    %33 = arith.addf %22, %32 : vector<1x128xf32>
    %c0_24 = arith.constant 0 : index
    %c0_25 = arith.constant 0 : index
    %34 = vector.load %arg3[%c0_24, %c0_25] : memref<1x128xf32, #tpu.memory_space<vmem>>, vector<1x128xf32>
    %35 = arith.addf %33, %34 : vector<1x128xf32>
    %cst_26 = arith.constant 0.000000e+00 : f32
    %36 = vector.broadcast %cst_26 : f32 to vector<1x128xf32>
    %37 = arith.maximumf %35, %36 : vector<1x128xf32>
    %c0_27 = arith.constant 0 : index
    %c0_28 = arith.constant 0 : index
    %38 = vector.load %arg4[%c0_27, %c0_28] : memref<1x128xf32, #tpu.memory_space<vmem>>, vector<1x128xf32>
    tpu.vector_store %arg4[%c0_27, %c0_28], %37 {strides = array<i32>} : memref<1x128xf32, #tpu.memory_space<vmem>>, vector<1x128xf32>,
    return
  }
  func.func @transform_0(%arg0: i32) -> (i32, i32, i32) {
    %c0_i32 = arith.constant 0 : i32
    %c0_i32_0 = arith.constant 0 : i32
    %c0_i32_1 = arith.constant 0 : i32
    %c0_i32_2 = arith.constant 0 : i32
    return %c0_i32, %c0_i32_0, %c0_i32_1 : i32, i32, i32
  }
  func.func @transform_1(%arg0: i32) -> (i32, i32, i32) {
    %c0_i32 = arith.constant 0 : i32
    %c0_i32_0 = arith.constant 0 : i32
    %c0_i32_1 = arith.constant 0 : i32
    return %c0_i32, %c0_i32_0, %arg0 : i32, i32, i32
  }
  func.func @transform_2(%arg0: i32) -> (i32, i32) {
    %c0_i32 = arith.constant 0 : i32
    %c0_i32_0 = arith.constant 0 : i32
    return %c0_i32, %arg0 : i32, i32
  }
  func.func @transform_3(%arg0: i32) -> (i32, i32) {
    %c0_i32 = arith.constant 0 : i32
    %c0_i32_0 = arith.constant 0 : i32
    return %c0_i32, %arg0 : i32, i32
  }
}

</mosaic_0001>

<bundles_post_ra>
// kernel: volume_estimation_forward.1
= control target key start
LH: loop header
LB: loop body
LE: loop exit
PB: predicated region body
PF: predicated region fallthrough
CT: control target
= control target key end

     0   :  { %8 = vsyncpa [#allocation3], 0  ;;  %s4214_s0 = inlined_call_operand.hbm [shape: f32[3,8,1024], index: 0, kind: input, shape index: {}]   ;;  %s4215_s1 = inlined_call_operand.hbm [shape: bf16[3,1024,512], index: 1, kind: input, shape index: {}]   ;;  %s4216_s2 = inlined_call_operand.hbm [shape: f32[1,512], index: 2, kind: input, shape index: {}]   ;;  %s4217_s3 = inlined_call_operand.vmem [shape: f32[1,512], index: 3, kind: output, shape index: {}]  }
   0x1   :  { %9 = vsyncpa [#allocation5], 0 }
   0x2   :  { %11 = vsyncpa [#allocation5 + $0x1], 0  ;;  %s3849_s12 = smov 0   ;;  %s3851_s13 = smov 0  }
   0x3   :  { %s3853_s14 = smov 0   ;;  %s3855_s15 = smov 0  }
   0x4 LB: > { %s3870_s16 = sadd.s32 1, %s3821_s15   ;;  %s45_s17 = sadd.s32 1, %s3817_s14  ;;  %s3821_s15 = sphi %s3855_s15, %s4224_s15   ;;  %s3817_s14 = sphi %s3853_s14, %s4223_s14   ;;  %s3813_s13 = sphi %s3851_s13, %s4222_s13   ;;  %s3809_s12 = sphi %s3849_s12, %s4221_s12  }
   0x5   : > { %s42_s18 = ssub.s32 %s3821_s15, %s3870_s16  ;;  %p52_p0 = scmp.ne.s32.totalorder %s3817_s14, %s3813_s13 }
   0x6   : > { %p43_p1 = scmp.eq.s32.totalorder %s42_s18, 0  ;;  %p53_p2 = scmp.eq.s32.totalorder %s3821_s15, 0 }
   0x7   : > { %p3651_p4 = scmp.lt.s32.totalorder %s3821_s15, 4  ;;  %s148_s20 = sand.u32 1, %s3821_s15  }
   0x8   : > { %s3879_s19 = scalar_select %p43_p1, %s3817_s14, %s45_s17  }
   0x9   : > { %p54_p3 = por %p53_p2, %p52_p0  ;;  %s150_s21 = sand.u32 1, %s3817_s14  }
   0xa   : > { %s3629_s22 = smul.u32 1536, %s150_s21  ;;  %s2408_s23 = sshll.u32 %s3821_s15, 2 }
   0xb   : > { %p3887_p5 = pnand %p3651_p4, %p54_p3  ;;  %s156_s27 = scalar_lea.hbm %s4215_s1, %s2408_s23 }
   0xc   : > { %s157_s28 = sshll.u32 %s156_s27, 4  ;;  %s152_s29 = scalar_lea.vmem [#allocation4], %s3629_s22  ;;  %s158_s28 = int_to_ptr.hbm [resolvable:$true] %s157_s28 }
   0xd   : > { %s159_s30 = sshll.u32 %s152_s29, 4  ;;  %s3894_s4 = scalar_lea.sflag [#allocation5], %s148_s20  ;;  %s160_s30 = int_to_ptr.vmem [resolvable:$true] %s159_s30 }
   0xe   : > { %s3693_s5 = sshra.s32 %s158_s28, 4  ;;  %p3697_p7 = pneg %p3887_p5  ;;  %s3694_s5 = int_to_ptr.hbm [resolvable:$true] %s3693_s5 }
   0xf   : > { %s3695_s6 = scalar_lea.hbm %s3694_s5, 1536  ;;  %s3700_s9 = scalar_lea.hbm %s4215_s1, 6144 }
  0x10   : > { %p3696_p6 = scmp.ne.s32.totalorder %s3694_s5, %s3695_s6  ;;  %p3701_p10 = scmp.lt.s32.totalorder %s3694_s5, %s4215_s1 }
  0x11   : > { %p3702_p11 = scmp.lt.s32.totalorder %s3700_s9, %s3695_s6 }
  0x12   : > { %p3698_p8 = pnand %p3697_p7, %p3696_p6 }
  0x13   : > { %p3703_p12 = por %p3702_p11, %p3701_p10 }
  0x14   : > { %p3699_p9 = pneg %p3698_p8 }
  0x16   : > { %p3704_p13 = pnand %p3703_p12, %p3699_p9 }
  0x18   : > { %3707 = shalt.err (!%p3704_p13)
}
  0x19   : > { %s3823_s17 = smov 256   ;;  %s3824_s18 = smov 64  }
  0x1a   : > { %s3825_s20 = smov 4   ;;  %s3911_s22 = sadd.s32 4294967295, %s3821_s15  }
  0x1b   : > { %3646 = dma.hbm_to_vmem [thread:$0]  (!%p3887_p5), %s158_s28, 24576, %s160_s30, %s3894_s4, %s3823_s17, %s3824_s18, %s3825_s20  }
  0x1c   : > { %p58_p0 = scmp.ne.s32.totalorder %s3813_s13, %s3809_s12  ;;  %p59_p1 = scmp.eq.s32.totalorder %s3911_s22, 0 }
  0x1d   : > { %p2405_p2 = scmp.ge.s32.totalorder %s3821_s15, 1  ;;  %p121_p3 = scmp.lt.s32.totalorder %s3821_s15, 5 }
  0x1e   : > { %p3920_p4 = por %p59_p1, %p58_p0  ;;  %s132_s28 = sshll.u32 %s4214_s0, 4  ;;  %s133_s28 = int_to_ptr.hbm [resolvable:$true] %s132_s28 }
  0x1f   : > { %p3924_p6 = pnand %p2405_p2, %p121_p3  ;;  %s3826_s12 = smov [#allocation2]  }
  0x20   : > { %s134_s29 = sshll.u32 %s3826_s12, 4  ;;  %s175_s6 = scalar_lea.hbm %s4216_s2, %s3821_s15  ;;  %s135_s29 = int_to_ptr.vmem [resolvable:$true] %s134_s29 }
  0x21   : > { %p3639_p8 = pneg %p3924_p6  ;;  %s172_s7 = scalar_lea.vmem [#allocation6], %s150_s21 }
  0x22   : > { %s179_s8 = sshll.u32 %s172_s7, 4  ;;  %s177_s9 = sshll.u32 %s175_s6, 4  ;;  %s178_s9 = int_to_ptr.hbm [resolvable:$true] %s177_s9  ;;  %s180_s8 = int_to_ptr.vmem [resolvable:$true] %s179_s8 }
  0x23   : > { %p3640_p9 = pnand %p3639_p8, %p59_p1  ;;  %s3827_s10 = smov 1024  }
  0x24   : > { %s3753_s11 = sshra.s32 %s178_s9, 4  ;;  %s3760_s15 = scalar_lea.hbm %s4216_s2, 4  ;;  %s3754_s11 = int_to_ptr.hbm [resolvable:$true] %s3753_s11 }
  0x25   : > { %3642 = dma.hbm_to_vmem [thread:$0]  (!%p3640_p9), %s133_s28, 3072, %s135_s29, [#allocation3], %s3827_s10, %s3827_s10, %s3824_s18  }
  0x26   : > { %s3755_s17 = scalar_lea.hbm %s3754_s11, 1  ;;  %p3761_p13 = scmp.lt.s32.totalorder %s3754_s11, %s4216_s2 }
  0x27   : > { %p3756_p10 = scmp.ne.s32.totalorder %s3754_s11, %s3755_s17  ;;  %p3762_p0 = scmp.lt.s32.totalorder %s3760_s15, %s3755_s17 }
  0x29   : > { %p3758_p11 = pnand %p3756_p10, %p3697_p7  ;;  %p3763_p2 = por %p3762_p0, %p3761_p13 }
  0x2b   : > { %p3759_p12 = pneg %p3758_p11 }
  0x2d   : > { %p3764_p3 = pnand %p3763_p2, %p3759_p12 }
  0x2f   : > { %3767 = shalt.err (!%p3764_p3)
}
  0x30   : > { %3649 = dma.hbm_to_vmem [thread:$0]  (!%p3887_p5), %s178_s9, 16, %s180_s8, %s3894_s4  }
  0x31   : > { %188 = sbr.rel (%p3924_p6) target bundleno = 397 (0x18d), region = 32 }
  0x36   : > { %3800 = dma.done.wait (%p59_p1), [#allocation3], 3072  }
  0x37   : > { %3802 = vsyncadd (%p59_p1), [#allocation3], 4294964224  ;;  %s195_s18 = sand.u32 1, %s3911_s22   ;;  %s197_s28 = sand.u32 1, %s3813_s13  }
  0x38   : > { %s3630_s12 = smul.u32 1536, %s197_s28  ;;  %s196_s24 = scalar_lea.sflag [#allocation5], %s195_s18 }
  0x3a   : > { %s3963_s29 = scalar_lea.vmem [#allocation4], %s3630_s12 }
  0x3b   : > { %3804 = dma.done.wait (%p3920_p4), %s196_s24, 24592  }
  0x3c   : > { %3806 = vsyncadd (%p3920_p4), %s196_s24, 4294942704  ;;  %v3508_v0 = vld [vmem:[%s3963_s29 + $0x238] sm:$0xff]  ;;  %v3507_v4 = vld [vmem:[%s3963_s29 + $0x230] sm:$0xff]  ;;  %v3828_v6 = vmov 8.0   ;;  %p234_p5 = scmp.lt.s32.totalorder %s3911_s22, 3  ;;  %s208_s4 = scalar_lea.vmem [#allocation6], %s197_s28 }
  0x3d   : > { %v3516_v1 = vld [vmem:[%s3963_s29 + $0x278] sm:$0xff]  ;;  %1030 = vmatpush.bf16.msra.mxu0 %v3508_v0  ;;  %v3515_v5 = vld [vmem:[%s3963_s29 + $0x270] sm:$0xff]  ;;  %3691 = vrcp.f32 %v3828_v6  ;;  %v3506_v9 = vld [vmem:[%s3963_s29 + $0x228] sm:$0xff] }
  0x3e   : > { %v3524_v2 = vld [vmem:[%s3963_s29 + $0x2b8] sm:$0xff]  ;;  %1043 = vmatpush.bf16.msra.mxu1 %v3516_v1  ;;  %v3523_v7 = vld [vmem:[%s3963_s29 + $0x2b0] sm:$0xff]  ;;  %v3514_v10 = vld [vmem:[%s3963_s29 + $0x268] sm:$0xff]  ;;  %s4226_s22 = smov (!%p234_p5, %s3911_s22), 3 }
  0x3f   : > { %v3532_v3 = vld [vmem:[%s3963_s29 + $0x2f8] sm:$0xff]  ;;  %1056 = vmatpush.bf16.msra.mxu2 %v3524_v2  ;;  %v3531_v8 = vld [vmem:[%s3963_s29 + $0x2f0] sm:$0xff]  ;;  %v3522_v11 = vld [vmem:[%s3963_s29 + $0x2a8] sm:$0xff]  ;;  %s236_s30 = scalar_lea.vmem %s4217_s3, %s4226_s22 }
  0x40   : > { %1069 = vmatpush.bf16.msra.mxu3 %v3532_v3  ;;  %v3530_v12 = vld [vmem:[%s3963_s29 + $0x2e8] sm:$0xff]  ;;  %v3505_v14 = vld [vmem:[%s3963_s29 + $0x220] sm:$0xff]  ;;  %v3504_v19 = vld [vmem:[%s3963_s29 + $0x218] sm:$0xff] }
  0x41   : > { %1031 = vmatpush.bf16.msra.mxu0 %v3507_v4  ;;  %v3513_v15 = vld [vmem:[%s3963_s29 + $0x260] sm:$0xff]  ;;  %v3512_v20 = vld [vmem:[%s3963_s29 + $0x258] sm:$0xff]  ;;  %v3503_v24 = vld [vmem:[%s3963_s29 + $0x210] sm:$0xff] }
  0x42   : > { %1044 = vmatpush.bf16.msra.mxu1 %v3515_v5  ;;  %v3521_v16 = vld [vmem:[%s3963_s29 + $0x2a0] sm:$0xff]  ;;  %v3520_v21 = vld [vmem:[%s3963_s29 + $0x298] sm:$0xff]  ;;  %v3511_v25 = vld [vmem:[%s3963_s29 + $0x250] sm:$0xff] }
  0x43   : > { %1057 = vmatpush.bf16.msra.mxu2 %v3523_v7  ;;  %v3981_v13 = vpop.eup %3691  ;;  %v3529_v17 = vld [vmem:[%s3963_s29 + $0x2e0] sm:$0xff]  ;;  %v3528_v22 = vld [vmem:[%s3963_s29 + $0x2d8] sm:$0xff]  ;;  %v447_v26 = vld [vmem:[#allocation2 + $0x50] sm:$0xff] }
  0x44   : > { %1070 = vmatpush.bf16.msra.mxu3 %v3531_v8  ;;  %v294_v18 = vmul.f32 8.0, %v3981_v13  ;;  %v465_v27 = vrot.slane %v447_v26, 4  ;;  %v445_v28 = vld [vmem:[#allocation2 + $0x40] sm:$0xff]  ;;  %v448_v29 = vld [vmem:[#allocation2 + $0x58] sm:$0xff]  ;;  %v446_v30 = vld [vmem:[#allocation2 + $0x48] sm:$0xff]  ;;  %vm298_vm0 = vweird.f32 %v3981_v13 }
  0x45   : > { %1032 = vmatpush.bf16.msra.mxu0 %v3506_v9  ;;  %v3519_v31 = vld [vmem:[%s3963_s29 + $0x290] sm:$0xff]  ;;  %v453_v34 = vrot.slane %v445_v28, 4  ;;  %v471_v35 = vrot.slane %v448_v29, 4  ;;  %v459_v36 = vrot.slane %v446_v30, 4  ;;  %v3502_v41 = vld [vmem:[%s3963_s29 + $0x208] sm:$0xff]  ;;  %v3501_v54 = vld [vmem:[%s3963_s29 + $0x200] sm:$0xff] }
  0x46   : > { %1045 = vmatpush.bf16.msra.mxu1 %v3514_v10  ;;  %v295_v23 = vsub.f32 1.0, %v294_v18  ;;  %v3527_v32 = vld [vmem:[%s3963_s29 + $0x2d0] sm:$0xff]  ;;  %v466_v37 = vadd.f32 %v465_v27, %v447_v26  ;;  %v3510_v42 = vld [vmem:[%s3963_s29 + $0x248] sm:$0xff]  ;;  %v3509_v55 = vld [vmem:[%s3963_s29 + $0x240] sm:$0xff] }
  0x47   : > { %1058 = vmatpush.bf16.msra.mxu2 %v3522_v11  ;;  %v454_v38 = vadd.f32 %v453_v34, %v445_v28  ;;  %v472_v39 = vadd.f32 %v471_v35, %v448_v29  ;;  %v460_v40 = vadd.f32 %v459_v36, %v446_v30  ;;  %v3518_v44 = vld [vmem:[%s3963_s29 + $0x288] sm:$0xff]  ;;  %v3517_v57 = vld [vmem:[%s3963_s29 + $0x280] sm:$0xff]  ;;  %v3540_v63 = vld [vmem:[%s3963_s29 + $0x338] sm:$0xff] }
  0x48   : > { %1071 = vmatpush.bf16.msra.mxu3 %v3530_v12  ;;  %v296_v33 = vmul.f32 %v3981_v13, %v295_v23  ;;  %v467_v43 = vrot.slane %v466_v37, 2  ;;  %v3526_v45 = vld [vmem:[%s3963_s29 + $0x2c8] sm:$0xff]  ;;  %v3525_v58 = vld [vmem:[%s3963_s29 + $0x2c0] sm:$0xff]  ;;  %v3548_v0 = vld [vmem:[%s3963_s29 + $0x378] sm:$0xff] }
  0x49   : > { %1033 = vmatpush.bf16.msra.mxu0 %v3505_v14  ;;  %v455_v47 = vrot.slane %v454_v38, 2  ;;  %v473_v48 = vrot.slane %v472_v39, 2  ;;  %v461_v49 = vrot.slane %v460_v40, 2  ;;  %v3556_v1 = vld [vmem:[%s3963_s29 + $0x3b8] sm:$0xff]  ;;  %v451_v7 = vld [vmem:[#allocation2 + $0x70] sm:$0xff]  ;;  %v449_v8 = vld [vmem:[#allocation2 + $0x60] sm:$0xff] }
  0x4a   : > { %1046 = vmatpush.bf16.msra.mxu1 %v3513_v15  ;;  %v297_v46 = vadd.f32 %v3981_v13, %v296_v33  ;;  %v468_v50 = vadd.f32 %v467_v43, %v466_v37  ;;  %v3564_v3 = vld [vmem:[%s3963_s29 + $0x3f8] sm:$0xff]  ;;  %v450_v11 = vld [vmem:[#allocation2 + $0x68] sm:$0xff]  ;;  %v3539_v15 = vld [vmem:[%s3963_s29 + $0x330] sm:$0xff]  ;;  %v489_v18 = vrot.slane %v451_v7, 4 }
  0x4b   : > { %1059 = vmatpush.bf16.msra.mxu2 %v3521_v16  ;;  %v456_v51 = vadd.f32 %v455_v47, %v454_v38  ;;  %v474_v52 = vadd.f32 %v473_v48, %v472_v39  ;;  %v462_v53 = vadd.f32 %v461_v49, %v460_v40  ;;  %v452_v10 = vld [vmem:[#allocation2 + $0x78] sm:$0xff]  ;;  %v3547_v16 = vld [vmem:[%s3963_s29 + $0x370] sm:$0xff]  ;;  %v3538_v27 = vld [vmem:[%s3963_s29 + $0x328] sm:$0xff] }
  0x4c   : > { %1072 = vmatpush.bf16.msra.mxu3 %v3529_v17  ;;  %v469_v56 = vrot.slane %v468_v50, 1  ;;  %v4008_v59 = vsel %vm298_vm0, %v3981_v13, %v297_v46  ;;  %v3546_v28 = vld [vmem:[%s3963_s29 + $0x368] sm:$0xff]  ;;  %v490_v29 = vadd.f32 %v489_v18, %v451_v7  ;;  %v3537_v35 = vld [vmem:[%s3963_s29 + $0x320] sm:$0xff]  ;;  %v3536_v43 = vld [vmem:[%s3963_s29 + $0x318] sm:$0xff] }
  0x4d   : > { %1034 = vmatpush.bf16.msra.mxu0 %v3504_v19  ;;  %v457_v60 = vrot.slane %v456_v51, 1  ;;  %v475_v61 = vrot.slane %v474_v52, 1  ;;  %v463_v62 = vrot.slane %v462_v53, 1  ;;  %v477_v19 = vrot.slane %v449_v8, 4  ;;  %v3545_v36 = vld [vmem:[%s3963_s29 + $0x360] sm:$0xff]  ;;  %v3552_v47 = vld [vmem:[%s3963_s29 + $0x398] sm:$0xff] }
  0x4e   : > { %1047 = vmatpush.bf16.msra.mxu1 %v3512_v20  ;;  %v470_v2 = vadd.f32 %v469_v56, %v468_v50  ;;  %v3555_v20 = vld [vmem:[%s3963_s29 + $0x3b0] sm:$0xff]  ;;  %v491_v37 = vrot.slane %v490_v29, 2  ;;  %v3553_v39 = vld [vmem:[%s3963_s29 + $0x3a0] sm:$0xff]  ;;  %v3560_v48 = vld [vmem:[%s3963_s29 + $0x3d8] sm:$0xff] }
  0x4f   : > { %1060 = vmatpush.bf16.msra.mxu2 %v3520_v21  ;;  %v458_v4 = vadd.f32 %v457_v60, %v456_v51  ;;  %v476_v5 = vadd.f32 %v475_v61, %v474_v52  ;;  %v464_v6 = vadd.f32 %v463_v62, %v462_v53  ;;  %v3563_v21 = vld [vmem:[%s3963_s29 + $0x3f0] sm:$0xff]  ;;  %v478_v30 = vadd.f32 %v477_v19, %v449_v8  ;;  %v3561_v40 = vld [vmem:[%s3963_s29 + $0x3e0] sm:$0xff]  ;;  %v3534_v60 = vld [vmem:[%s3963_s29 + $0x308] sm:$0xff] }
  0x50   : > { %1073 = vmatpush.bf16.msra.mxu3 %v3528_v22  ;;  %v503_v9 = vmul.f32 %v470_v2, %v4008_v59  ;;  %v3535_v51 = vld [vmem:[%s3963_s29 + $0x310] sm:$0xff]  ;;  %v3542_v61 = vld [vmem:[%s3963_s29 + $0x348] sm:$0xff]  ;;  %v3549_v8 = vld [vmem:[%s3963_s29 + $0x380] sm:$0xff] }
  0x51   : > { %1035 = vmatpush.bf16.msra.mxu0 %v3503_v24  ;;  %v501_v12 = vmul.f32 %v458_v4, %v4008_v59  ;;  %v504_v13 = vmul.f32 %v476_v5, %v4008_v59  ;;  %v502_v14 = vmul.f32 %v464_v6, %v4008_v59  ;;  %v495_v24 = vrot.slane %v452_v10, 4  ;;  %v3543_v52 = vld [vmem:[%s3963_s29 + $0x350] sm:$0xff]  ;;  %v3533_v4 = vld [vmem:[%s3963_s29 + $0x300] sm:$0xff] }
  0x52   : > { %1048 = vmatpush.bf16.msra.mxu1 %v3511_v25  ;;  %v511_v17 = vpack.c.bf16 %v503_v9, %v503_v9  ;;  %v483_v25 = vrot.slane %v450_v11, 4  ;;  %v479_v38 = vrot.slane %v478_v30, 2  ;;  %v3559_v56 = vld [vmem:[%s3963_s29 + $0x3d0] sm:$0xff]  ;;  %v3541_v5 = vld [vmem:[%s3963_s29 + $0x340] sm:$0xff] }
  0x53   : > { %1061 = vmatpush.bf16.msra.mxu2 %v3519_v31  ;;  %v509_v22 = vpack.c.bf16 %v501_v12, %v501_v12  ;;  %v512_v23 = vpack.c.bf16 %v504_v13, %v504_v13  ;;  %v510_v26 = vpack.c.bf16 %v502_v14, %v502_v14  ;;  %v3554_v31 = vld [vmem:[%s3963_s29 + $0x3a8] sm:$0xff]  ;;  %v496_v33 = vadd.f32 %v495_v24, %v452_v10  ;;  %v3557_v9 = vld [vmem:[%s3963_s29 + $0x3c0] sm:$0xff]  ;;  %v3444_v12 = vld [vmem:[%s3963_s29 + $0x38] sm:$0xff] }
  0x54   : > { %1074 = vmatpush.bf16.msra.mxu3 %v3527_v32  ;;  %v3562_v32 = vld [vmem:[%s3963_s29 + $0x3e8] sm:$0xff]  ;;  %v484_v34 = vadd.f32 %v483_v25, %v450_v11  ;;  %v480_v46 = vadd.f32 %v479_v38, %v478_v30  ;;  %v3452_v13 = vld [vmem:[%s3963_s29 + $0x78] sm:$0xff]  ;;  %v3443_v24 = vld [vmem:[%s3963_s29 + $0x30] sm:$0xff] }
  0x55   : > { %1036 = vmatpush.bf16.msra.mxu0 %v3502_v41  ;;  %v497_v41 = vrot.slane %v496_v33, 2  ;;  %v3460_v14 = vld [vmem:[%s3963_s29 + $0xb8] sm:$0xff]  ;;  %v3451_v25 = vld [vmem:[%s3963_s29 + $0x70] sm:$0xff] }
  0x56   : > { %1049 = vmatpush.bf16.msra.mxu1 %v3510_v42  ;;  %v485_v42 = vrot.slane %v484_v34, 2 }
  0x57   : > { %1062 = vmatpush.bf16.msra.mxu2 %v3518_v44  ;;  %v3544_v44 = vld [vmem:[%s3963_s29 + $0x358] sm:$0xff]  ;;  %v498_v49 = vadd.f32 %v497_v41, %v496_v33  ;;  %v3450_v33 = vld [vmem:[%s3963_s29 + $0x68] sm:$0xff]  ;;  %v3449_v41 = vld [vmem:[%s3963_s29 + $0x60] sm:$0xff] }
  0x58   : > { %1075 = vmatpush.bf16.msra.mxu3 %v3526_v45  ;;  %v492_v45 = vadd.f32 %v491_v37, %v490_v29  ;;  %v486_v50 = vadd.f32 %v485_v42, %v484_v34  ;;  %v3467_v29 = vld [vmem:[%s3963_s29 + $0xf0] sm:$0xff]  ;;  %v3466_v37 = vld [vmem:[%s3963_s29 + $0xe8] sm:$0xff] }
  0x59   : > { %1037 = vmatpush.bf16.msra.mxu0 %v3501_v54  ;;  %v481_v54 = vrot.slane %v480_v46, 1 }
  0x5a   : > { %1050 = vmatpush.bf16.msra.mxu1 %v3509_v55  ;;  %v493_v53 = vrot.slane %v492_v45, 1  ;;  %v3551_v55 = vld [vmem:[%s3963_s29 + $0x390] sm:$0xff] }
  0x5b   : > { %1063 = vmatpush.bf16.msra.mxu2 %v3517_v57  ;;  %v499_v57 = vrot.slane %v498_v49, 1 }
  0x5c   : > { %1076 = vmatpush.bf16.msra.mxu3 %v3525_v58  ;;  %1038 = vmatmul.bf16.vlgmr.msra.gmra.mxu0 %v509_v22  ;;  %v487_v58 = vrot.slane %v486_v50, 1  ;;  %v494_v62 = vadd.f32 %v493_v53, %v492_v45  ;;  %v3465_v45 = vld [vmem:[%s3963_s29 + $0xe0] sm:$0xff]  ;;  %v3464_v53 = vld [vmem:[%s3963_s29 + $0xd8] sm:$0xff] }
  0x5d   : > { %1082 = vmatpush.bf16.msrb.mxu0 %v3540_v63  ;;  %1051 = vmatmul.bf16.vlgmr.msra.gmra.mxu1 %v510_v26  ;;  %v482_v63 = vadd.f32 %v481_v54, %v480_v46  ;;  %v500_v2 = vadd.f32 %v499_v57, %v498_v49  ;;  %v3448_v49 = vld [vmem:[%s3963_s29 + $0x58] sm:$0xff]  ;;  %v3447_v57 = vld [vmem:[%s3963_s29 + $0x50] sm:$0xff] }
  0x5e   : > { %1095 = vmatpush.bf16.msrb.mxu1 %v3548_v0  ;;  %1064 = vmatmul.bf16.vlgmr.msra.gmra.mxu2 %v511_v17  ;;  %v3550_v0 = vld [vmem:[%s3963_s29 + $0x388] sm:$0xff]  ;;  %v507_v6 = vmul.f32 %v494_v62, %v4008_v59  ;;  %v239_v17 = vld [vmem:[#allocation2 + $0x10] sm:$0xff] }
  0x5f   : > { %1108 = vmatpush.bf16.msrb.mxu2 %v3556_v1  ;;  %1077 = vmatmul.bf16.vlgmr.msra.gmra.mxu3 %v512_v23  ;;  %v3558_v1 = vld [vmem:[%s3963_s29 + $0x3c8] sm:$0xff]  ;;  %v505_v7 = vmul.f32 %v482_v63, %v4008_v59  ;;  %v508_v10 = vmul.f32 %v500_v2, %v4008_v59  ;;  %v3463_v62 = vld [vmem:[%s3963_s29 + $0xd0] sm:$0xff] }
  0x60   : > { %1121 = vmatpush.bf16.msrb.mxu3 %v3564_v3  ;;  %v488_v3 = vadd.f32 %v487_v58, %v486_v50  ;;  %v515_v18 = vpack.c.bf16 %v507_v6, %v507_v6  ;;  %v3446_v2 = vld [vmem:[%s3963_s29 + $0x48] sm:$0xff] }
  0x61   : > { %1083 = vmatpush.bf16.msrb.mxu0 %v3539_v15  ;;  %v3468_v15 = vld [vmem:[%s3963_s29 + $0xf8] sm:$0xff]  ;;  %v513_v19 = vpack.c.bf16 %v505_v7, %v505_v7  ;;  %v516_v22 = vpack.c.bf16 %v508_v10, %v508_v10  ;;  %v3462_v6 = vld [vmem:[%s3963_s29 + $0xc8] sm:$0xff]  ;;  %v3445_v10 = vld [vmem:[%s3963_s29 + $0x40] sm:$0xff] }
  0x62   : > { %1096 = vmatpush.bf16.msrb.mxu1 %v3547_v16  ;;  %v506_v11 = vmul.f32 %v488_v3, %v4008_v59  ;;  %v237_v16 = vld [vmem:[#allocation2] sm:$0xff] }
  0x63   : > { %1109 = vmatpush.bf16.msrb.mxu2 %v3555_v20  ;;  %v238_v20 = vld [vmem:[#allocation2 + $0x8] sm:$0xff]  ;;  %v245_v26 = vrot.slane %v237_v16, 4 }
  0x64   : > { %1122 = vmatpush.bf16.msrb.mxu3 %v3563_v21  ;;  %v240_v21 = vld [vmem:[#allocation2 + $0x18] sm:$0xff]  ;;  %v514_v23 = vpack.c.bf16 %v506_v11, %v506_v11  ;;  %v251_v30 = vrot.slane %v238_v20, 4 }
  0x65   : > { %1084 = vmatpush.bf16.msrb.mxu0 %v3538_v27  ;;  %v257_v27 = vrot.slane %v239_v17, 4  ;;  %v246_v34 = vadd.f32 %v245_v26, %v237_v16  ;;  %v244_v26 = vld [vmem:[#allocation2 + $0x38] sm:$0xff] }
  0x66   : > { %1097 = vmatpush.bf16.msrb.mxu1 %v3546_v28  ;;  %v3459_v28 = vld [vmem:[%s3963_s29 + $0xb0] sm:$0xff]  ;;  %v252_v38 = vadd.f32 %v251_v30, %v238_v20  ;;  %v3500_v20 = vld [vmem:[%s3963_s29 + $0x1f8] sm:$0xff] }
  0x67   : > { %1110 = vmatpush.bf16.msrb.mxu2 %v3554_v31  ;;  %v263_v31 = vrot.slane %v240_v21, 4  ;;  %v247_v42 = vrot.slane %v246_v34, 2  ;;  %v3483_v30 = vld [vmem:[%s3963_s29 + $0x170] sm:$0xff] }
  0x68   : > { %1123 = vmatpush.bf16.msrb.mxu3 %v3562_v32  ;;  %v3442_v32 = vld [vmem:[%s3963_s29 + $0x28] sm:$0xff]  ;;  %v253_v46 = vrot.slane %v252_v38, 2 }
  0x69   : > { %1085 = vmatpush.bf16.msrb.mxu0 %v3537_v35  ;;  %v258_v35 = vadd.f32 %v257_v27, %v239_v17  ;;  %v248_v50 = vadd.f32 %v247_v42, %v246_v34  ;;  %v3476_v17 = vld [vmem:[%s3963_s29 + $0x138] sm:$0xff]  ;;  %v3499_v34 = vld [vmem:[%s3963_s29 + $0x1f0] sm:$0xff]  ;;  %v3498_v42 = vld [vmem:[%s3963_s29 + $0x1e8] sm:$0xff] }
  0x6a   : > { %1098 = vmatpush.bf16.msrb.mxu1 %v3545_v36  ;;  %v3458_v36 = vld [vmem:[%s3963_s29 + $0xa8] sm:$0xff]  ;;  %v254_v54 = vadd.f32 %v253_v46, %v252_v38  ;;  %v3481_v46 = vld [vmem:[%s3963_s29 + $0x160] sm:$0xff] }
  0x6b   : > { %1111 = vmatpush.bf16.msrb.mxu2 %v3553_v39  ;;  %v264_v39 = vadd.f32 %v263_v31, %v240_v21  ;;  %v249_v58 = vrot.slane %v248_v50, 1  ;;  %v241_v21 = vld [vmem:[#allocation2 + $0x20] sm:$0xff]  ;;  %v3482_v38 = vld [vmem:[%s3963_s29 + $0x168] sm:$0xff] }
  0x6c   : > { %1124 = vmatpush.bf16.msrb.mxu3 %v3561_v40  ;;  %v3441_v40 = vld [vmem:[%s3963_s29 + $0x20] sm:$0xff]  ;;  %v255_v63 = vrot.slane %v254_v54, 1  ;;  %v269_v31 = vrot.slane %v241_v21, 4 }
  0x6d   : > { %1086 = vmatpush.bf16.msrb.mxu0 %v3536_v43  ;;  %v259_v43 = vrot.slane %v258_v35, 2  ;;  %v250_v3 = vadd.f32 %v249_v58, %v248_v50  ;;  %v3497_v50 = vld [vmem:[%s3963_s29 + $0x1e0] sm:$0xff]  ;;  %v3496_v58 = vld [vmem:[%s3963_s29 + $0x1d8] sm:$0xff] }
  0x6e   : > { %1099 = vmatpush.bf16.msrb.mxu1 %v3544_v44  ;;  %v3457_v44 = vld [vmem:[%s3963_s29 + $0xa0] sm:$0xff]  ;;  %v256_v7 = vadd.f32 %v255_v63, %v254_v54  ;;  %v3480_v54 = vld [vmem:[%s3963_s29 + $0x158] sm:$0xff]  ;;  %v3479_v63 = vld [vmem:[%s3963_s29 + $0x150] sm:$0xff] }
  0x6f   : > { %1112 = vmatpush.bf16.msrb.mxu2 %v3552_v47  ;;  %v265_v47 = vrot.slane %v264_v39, 2  ;;  %v300_v11 = vmul.f32 %v4008_v59, %v250_v3  ;;  %v3495_v3 = vld [vmem:[%s3963_s29 + $0x1d0] sm:$0xff] }
  0x70   : > { %1125 = vmatpush.bf16.msrb.mxu3 %v3560_v48  ;;  %v3440_v48 = vld [vmem:[%s3963_s29 + $0x18] sm:$0xff] }
  0x71   : > { %1087 = vmatpush.bf16.msrb.mxu0 %v3535_v51  ;;  %v260_v51 = vadd.f32 %v259_v43, %v258_v35 }
  0x72   : > { %1100 = vmatpush.bf16.msrb.mxu1 %v3543_v52  ;;  %v3456_v52 = vld [vmem:[%s3963_s29 + $0x98] sm:$0xff] }
  0x73   : > { %1113 = vmatpush.bf16.msrb.mxu2 %v3551_v55  ;;  %v266_v55 = vadd.f32 %v265_v47, %v264_v39  ;;  %v270_v39 = vadd.f32 %v269_v31, %v241_v21  ;;  %v1624_v31 = vld [vmem:[#allocation2 + $0x88] sm:$0xff] }
  0x74   : > { %1126 = vmatpush.bf16.msrb.mxu3 %v3559_v56  ;;  %v3439_v56 = vld [vmem:[%s3963_s29 + $0x10] sm:$0xff] }
  0x75   : > { %1088 = vmatpush.bf16.msrb.mxu0 %v3534_v60  ;;  %v261_v60 = vrot.slane %v260_v51, 1  ;;  %v271_v47 = vrot.slane %v270_v39, 2 }
  0x76   : > { %1101 = vmatpush.bf16.msrb.mxu1 %v3542_v61  ;;  %v3455_v61 = vld [vmem:[%s3963_s29 + $0x90] sm:$0xff] }
  0x77   : > { %1114 = vmatpush.bf16.msrb.mxu2 %v3550_v0  ;;  %v267_v0 = vrot.slane %v266_v55, 1 }
  0x78   : > { %1127 = vmatpush.bf16.msrb.mxu3 %v3558_v1  ;;  %v3438_v1 = vld [vmem:[%s3963_s29 + $0x8] sm:$0xff] }
  0x79   : > { %1089 = vmatpush.bf16.msrb.mxu0 %v3533_v4  ;;  %v262_v4 = vadd.f32 %v261_v60, %v260_v51 }
  0x7a   : > { %1102 = vmatpush.bf16.msrb.mxu1 %v3541_v5  ;;  %v3454_v5 = vld [vmem:[%s3963_s29 + $0x88] sm:$0xff] }
  0x7b   : > { %1115 = vmatpush.bf16.msrb.mxu2 %v3549_v8  ;;  %v268_v8 = vadd.f32 %v267_v0, %v266_v55  ;;  %v272_v55 = vadd.f32 %v271_v47, %v270_v39  ;;  %v3595_v39 = vld [vmem:[%s3963_s29 + $0x4f0] sm:$0xff]  ;;  %v3594_v47 = vld [vmem:[%s3963_s29 + $0x4e8] sm:$0xff] }
  0x7c   : > { %1128 = vmatpush.bf16.msrb.mxu3 %v3557_v9  ;;  %1090 = vmatmul.bf16.vlgmr.msrb.gmra.mxu0 %v513_v19  ;;  %v3437_v9 = vld [vmem:[%s3963_s29] sm:$0xff]  ;;  %v3492_v19 = vld [vmem:[%s3963_s29 + $0x1b8] sm:$0xff] }
  0x7d   : > { %1518 = vmatpush.bf16.msra.mxu0 %v3444_v12  ;;  %1103 = vmatmul.bf16.vlgmr.msrb.gmra.mxu1 %v514_v23  ;;  %v302_v12 = vmul.f32 %v4008_v59, %v262_v4  ;;  %v303_v16 = vmul.f32 %v4008_v59, %v268_v8  ;;  %v308_v23 = vpack.c.bf16 %v300_v11, %v300_v11  ;;  %v273_v0 = vrot.slane %v272_v55, 1  ;;  %v3494_v11 = vld [vmem:[%s3963_s29 + $0x1c8] sm:$0xff] }
  0x7e   : > { %1531 = vmatpush.bf16.msra.mxu1 %v3452_v13  ;;  %1116 = vmatmul.bf16.vlgmr.msrb.gmra.mxu2 %v515_v18  ;;  %v3453_v13 = vld [vmem:[%s3963_s29 + $0x80] sm:$0xff]  ;;  %v3484_v18 = vld [vmem:[%s3963_s29 + $0x178] sm:$0xff] }
  0x7f   : > { %1544 = vmatpush.bf16.msra.mxu2 %v3460_v14  ;;  %1129 = vmatmul.bf16.vlgmr.msrb.gmra.mxu3 %v516_v22  ;;  %v3461_v14 = vld [vmem:[%s3963_s29 + $0xc0] sm:$0xff]  ;;  %v243_v22 = vld [vmem:[#allocation2 + $0x30] sm:$0xff]  ;;  %v274_v8 = vadd.f32 %v273_v0, %v272_v55  ;;  %v3592_v0 = vld [vmem:[%s3963_s29 + $0x4d8] sm:$0xff] }
  0x80   : > { %1557 = vmatpush.bf16.msra.mxu3 %v3468_v15  ;;  %v301_v15 = vmul.f32 %v4008_v59, %v256_v7  ;;  %v3478_v7 = vld [vmem:[%s3963_s29 + $0x148] sm:$0xff]  ;;  %v3593_v55 = vld [vmem:[%s3963_s29 + $0x4e0] sm:$0xff] }
  0x81   : > { %1519 = vmatpush.bf16.msra.mxu0 %v3443_v24  ;;  %v310_v24 = vpack.c.bf16 %v302_v12, %v302_v12 }
  0x82   : > { %1532 = vmatpush.bf16.msra.mxu1 %v3451_v25  ;;  %v242_v25 = vld [vmem:[#allocation2 + $0x28] sm:$0xff]  ;;  %v309_v27 = vpack.c.bf16 %v301_v15, %v301_v15  ;;  %v3477_v15 = vld [vmem:[%s3963_s29 + $0x140] sm:$0xff] }
  0x83   : > { %1545 = vmatpush.bf16.msra.mxu2 %v3459_v28  ;;  %v311_v28 = vpack.c.bf16 %v303_v16, %v303_v16  ;;  %v275_v35 = vrot.slane %v242_v25, 4  ;;  %v304_v16 = vmul.f32 %v4008_v59, %v274_v8  ;;  %v3591_v8 = vld [vmem:[%s3963_s29 + $0x4d0] sm:$0xff] }
  0x84   : > { %1558 = vmatpush.bf16.msra.mxu3 %v3467_v29  ;;  %v3475_v29 = vld [vmem:[%s3963_s29 + $0x130] sm:$0xff] }
  0x85   : > { %1520 = vmatpush.bf16.msra.mxu0 %v3442_v32  ;;  %v281_v32 = vrot.slane %v243_v22, 4  ;;  %v276_v43 = vadd.f32 %v275_v35, %v242_v25  ;;  %v3596_v25 = vld [vmem:[%s3963_s29 + $0x4f8] sm:$0xff]  ;;  %v3579_v35 = vld [vmem:[%s3963_s29 + $0x470] sm:$0xff] }
  0x86   : > { %1533 = vmatpush.bf16.msra.mxu1 %v3450_v33  ;;  %v3491_v33 = vld [vmem:[%s3963_s29 + $0x1b0] sm:$0xff] }
  0x87   : > { %1546 = vmatpush.bf16.msra.mxu2 %v3458_v36  ;;  %v287_v36 = vrot.slane %v244_v26, 4  ;;  %v277_v51 = vrot.slane %v276_v43, 2 }
  0x88   : > { %1559 = vmatpush.bf16.msra.mxu3 %v3466_v37  ;;  %v3474_v37 = vld [vmem:[%s3963_s29 + $0x128] sm:$0xff] }
  0x89   : > { %1521 = vmatpush.bf16.msra.mxu0 %v3441_v40  ;;  %v282_v40 = vadd.f32 %v281_v32, %v243_v22  ;;  %v278_v60 = vadd.f32 %v277_v51, %v276_v43  ;;  %v3572_v22 = vld [vmem:[%s3963_s29 + $0x438] sm:$0xff]  ;;  %v3578_v43 = vld [vmem:[%s3963_s29 + $0x468] sm:$0xff]  ;;  %v3577_v51 = vld [vmem:[%s3963_s29 + $0x460] sm:$0xff] }
  0x8a   : > { %1534 = vmatpush.bf16.msra.mxu1 %v3449_v41  ;;  %v3490_v41 = vld [vmem:[%s3963_s29 + $0x1a8] sm:$0xff] }
  0x8b   : > { %1547 = vmatpush.bf16.msra.mxu2 %v3457_v44  ;;  %v288_v44 = vadd.f32 %v287_v36, %v244_v26  ;;  %v279_v4 = vrot.slane %v278_v60, 1  ;;  %v1625_v26 = vld [vmem:[#allocation2 + $0x90] sm:$0xff] }
  0x8c   : > { %1560 = vmatpush.bf16.msra.mxu3 %v3465_v45  ;;  %v3473_v45 = vld [vmem:[%s3963_s29 + $0x120] sm:$0xff]  ;;  %v1643_v36 = vrot.slane %v1625_v26, 4 }
  0x8d   : > { %1522 = vmatpush.bf16.msra.mxu0 %v3440_v48  ;;  %v283_v48 = vrot.slane %v282_v40, 2  ;;  %v280_v12 = vadd.f32 %v279_v4, %v278_v60  ;;  %v3576_v60 = vld [vmem:[%s3963_s29 + $0x458] sm:$0xff]  ;;  %v3575_v4 = vld [vmem:[%s3963_s29 + $0x450] sm:$0xff] }
  0x8e   : > { %1535 = vmatpush.bf16.msra.mxu1 %v3448_v49  ;;  %v3489_v49 = vld [vmem:[%s3963_s29 + $0x1a0] sm:$0xff] }
  0x8f   : > { %1548 = vmatpush.bf16.msra.mxu2 %v3456_v52  ;;  %v289_v52 = vrot.slane %v288_v44, 2 }
  0x90   : > { %1561 = vmatpush.bf16.msra.mxu3 %v3464_v53  ;;  %v3472_v53 = vld [vmem:[%s3963_s29 + $0x118] sm:$0xff] }
  0x91   : > { %1523 = vmatpush.bf16.msra.mxu0 %v3439_v56  ;;  %v284_v56 = vadd.f32 %v283_v48, %v282_v40 }
  0x92   : > { %1536 = vmatpush.bf16.msra.mxu1 %v3447_v57  ;;  %v3488_v57 = vld [vmem:[%s3963_s29 + $0x198] sm:$0xff] }
  0x93   : > { %1549 = vmatpush.bf16.msra.mxu2 %v3455_v61  ;;  %v290_v61 = vadd.f32 %v289_v52, %v288_v44  ;;  %v1644_v44 = vadd.f32 %v1643_v36, %v1625_v26  ;;  %v3612_v26 = vld [vmem:[%s3963_s29 + $0x578] sm:$0xff] }
  0x94   : > { %1562 = vmatpush.bf16.msra.mxu3 %v3463_v62  ;;  %v3471_v62 = vld [vmem:[%s3963_s29 + $0x110] sm:$0xff] }
  0x95   : > { %1524 = vmatpush.bf16.msra.mxu0 %v3438_v1  ;;  %v285_v1 = vrot.slane %v284_v56, 1  ;;  %v1645_v52 = vrot.slane %v1644_v44, 2 }
  0x96   : > { %1537 = vmatpush.bf16.msra.mxu1 %v3446_v2  ;;  %v3487_v2 = vld [vmem:[%s3963_s29 + $0x190] sm:$0xff] }
  0x97   : > { %1550 = vmatpush.bf16.msra.mxu2 %v3454_v5  ;;  %v291_v5 = vrot.slane %v290_v61, 1 }
  0x98   : > { %1563 = vmatpush.bf16.msra.mxu3 %v3462_v6  ;;  %v3470_v6 = vld [vmem:[%s3963_s29 + $0x108] sm:$0xff] }
  0x99   : > { %1525 = vmatpush.bf16.msra.mxu0 %v3437_v9  ;;  %v286_v9 = vadd.f32 %v285_v1, %v284_v56 }
  0x9a   : > { %1538 = vmatpush.bf16.msra.mxu1 %v3445_v10  ;;  %v3486_v10 = vld [vmem:[%s3963_s29 + $0x188] sm:$0xff] }
  0x9b   : > { %1551 = vmatpush.bf16.msra.mxu2 %v3453_v13  ;;  %v292_v13 = vadd.f32 %v291_v5, %v290_v61  ;;  %v1646_v61 = vadd.f32 %v1645_v52, %v1644_v44 }
  0x9c   : > { %1564 = vmatpush.bf16.msra.mxu3 %v3461_v14  ;;  %1526 = vmatmul.bf16.vlgmr.msra.gmra.mxu0 %v308_v23  ;;  %v3469_v14 = vld [vmem:[%s3963_s29 + $0x100] sm:$0xff]  ;;  %v3580_v23 = vld [vmem:[%s3963_s29 + $0x478] sm:$0xff] }
  0x9d   : > { %1570 = vmatpush.bf16.msrb.mxu0 %v3476_v17  ;;  %1539 = vmatmul.bf16.vlgmr.msra.gmra.mxu1 %v309_v27  ;;  %v306_v17 = vmul.f32 %v4008_v59, %v286_v9  ;;  %v307_v21 = vmul.f32 %v4008_v59, %v292_v13  ;;  %v1623_v27 = vld [vmem:[#allocation2 + $0x80] sm:$0xff]  ;;  %v1647_v5 = vrot.slane %v1646_v61, 1 }
  0x9e   : > { %1583 = vmatpush.bf16.msrb.mxu1 %v3484_v18  ;;  %1552 = vmatmul.bf16.vlgmr.msra.gmra.mxu2 %v310_v24  ;;  %v3485_v18 = vld [vmem:[%s3963_s29 + $0x180] sm:$0xff]  ;;  %v3588_v24 = vld [vmem:[%s3963_s29 + $0x4b8] sm:$0xff] }
  0x9f   : > { %1596 = vmatpush.bf16.msrb.mxu2 %v3492_v19  ;;  %1565 = vmatmul.bf16.vlgmr.msra.gmra.mxu3 %v311_v28  ;;  %v3493_v19 = vld [vmem:[%s3963_s29 + $0x1c0] sm:$0xff]  ;;  %v312_v28 = vpack.c.bf16 %v304_v16, %v304_v16  ;;  %v1648_v13 = vadd.f32 %v1647_v5, %v1646_v61  ;;  %v3590_v16 = vld [vmem:[%s3963_s29 + $0x4c8] sm:$0xff]  ;;  %v3608_v5 = vld [vmem:[%s3963_s29 + $0x558] sm:$0xff] }
  0xa0   : > { %1609 = vmatpush.bf16.msrb.mxu3 %v3500_v20  ;;  %v305_v20 = vmul.f32 %v4008_v59, %v280_v12  ;;  %v3574_v12 = vld [vmem:[%s3963_s29 + $0x448] sm:$0xff] }
  0xa1   : > { %1571 = vmatpush.bf16.msrb.mxu0 %v3475_v29  ;;  %v314_v29 = vpack.c.bf16 %v306_v17, %v306_v17 }
  0xa2   : > { %1584 = vmatpush.bf16.msrb.mxu1 %v3483_v30  ;;  %v1626_v30 = vld [vmem:[#allocation2 + $0x98] sm:$0xff]  ;;  %v313_v32 = vpack.c.bf16 %v305_v20, %v305_v20  ;;  %v3573_v20 = vld [vmem:[%s3963_s29 + $0x440] sm:$0xff] }
  0xa3   : > { %1597 = vmatpush.bf16.msrb.mxu2 %v3491_v33  ;;  %v315_v33 = vpack.c.bf16 %v307_v21, %v307_v21  ;;  %v1649_v40 = vrot.slane %v1626_v30, 4  ;;  %v3581_v21 = vld [vmem:[%s3963_s29 + $0x480] sm:$0xff] }
  0xa4   : > { %1610 = vmatpush.bf16.msrb.mxu3 %v3499_v34  ;;  %v3571_v34 = vld [vmem:[%s3963_s29 + $0x430] sm:$0xff] }
  0xa5   : > { %1572 = vmatpush.bf16.msrb.mxu0 %v3474_v37  ;;  %v1631_v37 = vrot.slane %v1623_v27, 4  ;;  %v1650_v48 = vadd.f32 %v1649_v40, %v1626_v30  ;;  %v1627_v30 = vld [vmem:[#allocation2 + $0xa0] sm:$0xff] }
  0xa6   : > { %1585 = vmatpush.bf16.msrb.mxu1 %v3482_v38  ;;  %v3587_v38 = vld [vmem:[%s3963_s29 + $0x4b0] sm:$0xff] }
  0xa7   : > { %1598 = vmatpush.bf16.msrb.mxu2 %v3490_v41  ;;  %v1637_v41 = vrot.slane %v1624_v31, 4  ;;  %v1651_v56 = vrot.slane %v1650_v48, 2 }
  0xa8   : > { %1611 = vmatpush.bf16.msrb.mxu3 %v3498_v42  ;;  %v3570_v42 = vld [vmem:[%s3963_s29 + $0x428] sm:$0xff] }
  0xa9   : > { %1573 = vmatpush.bf16.msrb.mxu0 %v3473_v45  ;;  %v1632_v45 = vadd.f32 %v1631_v37, %v1623_v27  ;;  %v1652_v1 = vadd.f32 %v1651_v56, %v1650_v48 }
  0xaa   : > { %1586 = vmatpush.bf16.msrb.mxu1 %v3481_v46  ;;  %v3586_v46 = vld [vmem:[%s3963_s29 + $0x4a8] sm:$0xff] }
  0xab   : > { %1599 = vmatpush.bf16.msrb.mxu2 %v3489_v49  ;;  %v1638_v49 = vadd.f32 %v1637_v41, %v1624_v31  ;;  %v1653_v9 = vrot.slane %v1652_v1, 1  ;;  %v1628_v31 = vld [vmem:[#allocation2 + $0xa8] sm:$0xff]  ;;  %v3603_v41 = vld [vmem:[%s3963_s29 + $0x530] sm:$0xff] }
  0xac   : > { %1612 = vmatpush.bf16.msrb.mxu3 %v3497_v50  ;;  %v3569_v50 = vld [vmem:[%s3963_s29 + $0x420] sm:$0xff]  ;;  %v1661_v40 = vrot.slane %v1628_v31, 4 }
  0xad   : > { %1574 = vmatpush.bf16.msrb.mxu0 %v3472_v53  ;;  %v1633_v53 = vrot.slane %v1632_v45, 2  ;;  %v1654_v17 = vadd.f32 %v1653_v9, %v1652_v1  ;;  %v3616_v9 = vld [vmem:[%s3963_s29 + $0x598] sm:$0xff] }
  0xae   : > { %1587 = vmatpush.bf16.msrb.mxu1 %v3480_v54  ;;  %v3585_v54 = vld [vmem:[%s3963_s29 + $0x4a0] sm:$0xff]  ;;  %v1662_v48 = vadd.f32 %v1661_v40, %v1628_v31  ;;  %v3614_v31 = vld [vmem:[%s3963_s29 + $0x588] sm:$0xff] }
  0xaf   : > { %1600 = vmatpush.bf16.msrb.mxu2 %v3488_v57  ;;  %v1639_v57 = vrot.slane %v1638_v49, 2  ;;  %v1682_v27 = vmul.f32 %v1654_v17, %v4008_v59  ;;  %v3607_v17 = vld [vmem:[%s3963_s29 + $0x550] sm:$0xff] }
  0xb0   : > { %1613 = vmatpush.bf16.msrb.mxu3 %v3496_v58  ;;  %v3568_v58 = vld [vmem:[%s3963_s29 + $0x418] sm:$0xff]  ;;  %v1663_v56 = vrot.slane %v1662_v48, 2 }
  0xb1   : > { %1575 = vmatpush.bf16.msrb.mxu0 %v3471_v62  ;;  %v1634_v62 = vadd.f32 %v1633_v53, %v1632_v45  ;;  %v1690_v37 = vpack.c.bf16 %v1682_v27, %v1682_v27  ;;  %v3619_v45 = vld [vmem:[%s3963_s29 + $0x5b0] sm:$0xff]  ;;  %v3618_v53 = vld [vmem:[%s3963_s29 + $0x5a8] sm:$0xff] }
  0xb2   : > { %1588 = vmatpush.bf16.msrb.mxu1 %v3479_v63  ;;  %v3584_v63 = vld [vmem:[%s3963_s29 + $0x498] sm:$0xff]  ;;  %v3598_v27 = vld [vmem:[%s3963_s29 + $0x508] sm:$0xff] }
  0xb3   : > { %1601 = vmatpush.bf16.msrb.mxu2 %v3487_v2  ;;  %v1640_v2 = vadd.f32 %v1639_v57, %v1638_v49  ;;  %v3602_v49 = vld [vmem:[%s3963_s29 + $0x528] sm:$0xff]  ;;  %v3601_v57 = vld [vmem:[%s3963_s29 + $0x520] sm:$0xff] }
  0xb4   : > { %1614 = vmatpush.bf16.msrb.mxu3 %v3495_v3  ;;  %v3567_v3 = vld [vmem:[%s3963_s29 + $0x410] sm:$0xff] }
  0xb5   : > { %1576 = vmatpush.bf16.msrb.mxu0 %v3470_v6  ;;  %v1635_v6 = vrot.slane %v1634_v62, 1 }
  0xb6   : > { %1589 = vmatpush.bf16.msrb.mxu1 %v3478_v7  ;;  %v3583_v7 = vld [vmem:[%s3963_s29 + $0x490] sm:$0xff] }
  0xb7   : > { %1602 = vmatpush.bf16.msrb.mxu2 %v3486_v10  ;;  %v1641_v10 = vrot.slane %v1640_v2, 1 }
  0xb8   : > { %1615 = vmatpush.bf16.msrb.mxu3 %v3494_v11  ;;  %v3566_v11 = vld [vmem:[%s3963_s29 + $0x408] sm:$0xff] }
  0xb9   : > { %1577 = vmatpush.bf16.msrb.mxu0 %v3469_v14  ;;  %v1636_v14 = vadd.f32 %v1635_v6, %v1634_v62 }
  0xba   : > { %1590 = vmatpush.bf16.msrb.mxu1 %v3477_v15  ;;  %v3582_v15 = vld [vmem:[%s3963_s29 + $0x488] sm:$0xff] }
  0xbb   : > { %1603 = vmatpush.bf16.msrb.mxu2 %v3485_v18  ;;  %v1642_v18 = vadd.f32 %v1641_v10, %v1640_v2  ;;  %v1664_v2 = vadd.f32 %v1663_v56, %v1662_v48  ;;  %v3624_v10 = vld [vmem:[%s3963_s29 + $0x5d8] sm:$0xff] }
  0xbc   : > { %1616 = vmatpush.bf16.msrb.mxu3 %v3493_v19  ;;  %1578 = vmatmul.bf16.vlgmr.msrb.gmra.mxu0 %v312_v28  ;;  %v3565_v19 = vld [vmem:[%s3963_s29 + $0x400] sm:$0xff] }
  0xbd   : > { %2208 = vmatpush.bf16.msra.mxu0 %v3572_v22  ;;  %1591 = vmatmul.bf16.vlgmr.msrb.gmra.mxu1 %v313_v32  ;;  %v1681_v22 = vmul.f32 %v1648_v13, %v4008_v59  ;;  %v1680_v28 = vmul.f32 %v1642_v18, %v4008_v59  ;;  %v3628_v32 = vld [vmem:[%s3963_s29 + $0x5f8] sm:$0xff] }
  0xbe   : > { %2221 = vmatpush.bf16.msra.mxu1 %v3580_v23  ;;  %1604 = vmatmul.bf16.vlgmr.msrb.gmra.mxu2 %v314_v29  ;;  %v1679_v23 = vmul.f32 %v1636_v14, %v4008_v59  ;;  %v3620_v29 = vld [vmem:[%s3963_s29 + $0x5b8] sm:$0xff] }
  0xbf   : > { %2234 = vmatpush.bf16.msra.mxu2 %v3588_v24  ;;  %1617 = vmatmul.bf16.vlgmr.msrb.gmra.mxu3 %v315_v33  ;;  %v3589_v24 = vld [vmem:[%s3963_s29 + $0x4c0] sm:$0xff]  ;;  %v1629_v33 = vld [vmem:[#allocation2 + $0xb0] sm:$0xff] }
  0xc0   : > { %2247 = vmatpush.bf16.msra.mxu3 %v3596_v25  ;;  %v3604_v25 = vld [vmem:[%s3963_s29 + $0x538] sm:$0xff]  ;;  %v1687_v36 = vpack.c.bf16 %v1679_v23, %v1679_v23  ;;  %v3623_v23 = vld [vmem:[%s3963_s29 + $0x5d0] sm:$0xff] }
  0xc1   : > { %2209 = vmatpush.bf16.msra.mxu0 %v3571_v34  ;;  %v1630_v34 = vld [vmem:[#allocation2 + $0xb8] sm:$0xff] }
  0xc2   : > { %2222 = vmatpush.bf16.msra.mxu1 %v3579_v35  ;;  %v1689_v35 = vpack.c.bf16 %v1681_v22, %v1681_v22  ;;  %v1673_v44 = vrot.slane %v1630_v34, 4  ;;  %v3615_v22 = vld [vmem:[%s3963_s29 + $0x590] sm:$0xff] }
  0xc3   : > { %2235 = vmatpush.bf16.msra.mxu2 %v3587_v38  ;;  %v1688_v38 = vpack.c.bf16 %v1680_v28, %v1680_v28  ;;  %v3606_v28 = vld [vmem:[%s3963_s29 + $0x548] sm:$0xff] }
  0xc4   : > { %2248 = vmatpush.bf16.msra.mxu3 %v3595_v39  ;;  %v1655_v39 = vrot.slane %v1627_v30, 4  ;;  %v1674_v52 = vadd.f32 %v1673_v44, %v1630_v34 }
  0xc5   : > { %2210 = vmatpush.bf16.msra.mxu0 %v3570_v42  ;;  %v3611_v42 = vld [vmem:[%s3963_s29 + $0x570] sm:$0xff] }
  0xc6   : > { %2223 = vmatpush.bf16.msra.mxu1 %v3578_v43  ;;  %v1667_v43 = vrot.slane %v1629_v33, 4  ;;  %v1675_v62 = vrot.slane %v1674_v52, 2 }
  0xc7   : > { %2236 = vmatpush.bf16.msra.mxu2 %v3586_v46  ;;  %v3627_v46 = vld [vmem:[%s3963_s29 + $0x5f0] sm:$0xff] }
  0xc8   : > { %2249 = vmatpush.bf16.msra.mxu3 %v3594_v47  ;;  %v1656_v47 = vadd.f32 %v1655_v39, %v1627_v30 }
  0xc9   : > { %2211 = vmatpush.bf16.msra.mxu0 %v3569_v50  ;;  %v3610_v50 = vld [vmem:[%s3963_s29 + $0x568] sm:$0xff] }
  0xca   : > { %2224 = vmatpush.bf16.msra.mxu1 %v3577_v51  ;;  %v1668_v51 = vadd.f32 %v1667_v43, %v1629_v33 }
  0xcb   : > { %2237 = vmatpush.bf16.msra.mxu2 %v3585_v54  ;;  %v3626_v54 = vld [vmem:[%s3963_s29 + $0x5e8] sm:$0xff] }
  0xcc   : > { %2250 = vmatpush.bf16.msra.mxu3 %v3593_v55  ;;  %v1657_v55 = vrot.slane %v1656_v47, 2  ;;  %v1669_v61 = vrot.slane %v1668_v51, 2 }
  0xcd   : > { %2212 = vmatpush.bf16.msra.mxu0 %v3568_v58  ;;  %v3609_v58 = vld [vmem:[%s3963_s29 + $0x560] sm:$0xff] }
  0xce   : > { %2225 = vmatpush.bf16.msra.mxu1 %v3576_v60  ;;  %v1658_v1 = vadd.f32 %v1657_v55, %v1656_v47  ;;  %v1670_v6 = vadd.f32 %v1669_v61, %v1668_v51 }
  0xcf   : > { %2238 = vmatpush.bf16.msra.mxu2 %v3584_v63  ;;  %v3617_v63 = vld [vmem:[%s3963_s29 + $0x5a0] sm:$0xff] }
  0xd0   : > { %2251 = vmatpush.bf16.msra.mxu3 %v3592_v0  ;;  %v3625_v0 = vld [vmem:[%s3963_s29 + $0x5e0] sm:$0xff]  ;;  %v1659_v14 = vrot.slane %v1658_v1, 1  ;;  %v1671_v18 = vrot.slane %v1670_v6, 1 }
  0xd1   : > { %2213 = vmatpush.bf16.msra.mxu0 %v3567_v3 }
  0xd2   : > { %2226 = vmatpush.bf16.msra.mxu1 %v3575_v4  ;;  %v3600_v4 = vld [vmem:[%s3963_s29 + $0x518] sm:$0xff] }
  0xd3   : > { %2239 = vmatpush.bf16.msra.mxu2 %v3583_v7  ;;  %v1676_v7 = vadd.f32 %v1675_v62, %v1674_v52 }
  0xd4   : > { %2252 = vmatpush.bf16.msra.mxu3 %v3591_v8 }
  0xd5   : > { %2214 = vmatpush.bf16.msra.mxu0 %v3566_v11 }
  0xd6   : > { %2227 = vmatpush.bf16.msra.mxu1 %v3574_v12 }
  0xd7   : > { %2240 = vmatpush.bf16.msra.mxu2 %v3582_v15  ;;  %v1665_v15 = vrot.slane %v1664_v2, 1 }
  0xd8   : > { %2253 = vmatpush.bf16.msra.mxu3 %v3590_v16  ;;  %v3599_v16 = vld [vmem:[%s3963_s29 + $0x510] sm:$0xff] }
  0xd9   : > { %2215 = vmatpush.bf16.msra.mxu0 %v3565_v19  ;;  %v1039_v60 = vpop.f32.mrf.mxu0  ;;  %v1677_v19 = vrot.slane %v1676_v7, 1 }
  0xda   : > { %2228 = vmatpush.bf16.msra.mxu1 %v3573_v20  ;;  %v1052_v3 = vpop.f32.mrf.mxu1 }
  0xdb   : > { %2241 = vmatpush.bf16.msra.mxu2 %v3581_v21  ;;  %v1053_v8 = vadd.f32 %v1052_v3, %v1039_v60  ;;  %v1678_v30 = vadd.f32 %v1677_v19, %v1676_v7 }
  0xdc   : > { %2254 = vmatpush.bf16.msra.mxu3 %v3589_v24  ;;  %2216 = vmatmul.bf16.vlgmr.msra.gmra.mxu0 %v1687_v36  ;;  %v1660_v24 = vadd.f32 %v1659_v14, %v1658_v1 }
  0xdd   : > { %2260 = vmatpush.bf16.msrb.mxu0 %v3604_v25  ;;  %2229 = vmatmul.bf16.vlgmr.msra.gmra.mxu1 %v1688_v38  ;;  %v1666_v25 = vadd.f32 %v1665_v15, %v1664_v2  ;;  %v3605_v38 = vld [vmem:[%s3963_s29 + $0x540] sm:$0xff]  ;;  %v1686_v40 = vmul.f32 %v1678_v30, %v4008_v59 }
  0xde   : > { %2273 = vmatpush.bf16.msrb.mxu1 %v3612_v26  ;;  %2242 = vmatmul.bf16.vlgmr.msra.gmra.mxu2 %v1689_v35  ;;  %v1683_v35 = vmul.f32 %v1660_v24, %v4008_v59 }
  0xdf   : > { %2286 = vmatpush.bf16.msrb.mxu2 %v3620_v29  ;;  %2255 = vmatmul.bf16.vlgmr.msra.gmra.mxu3 %v1690_v37  ;;  %v1672_v29 = vadd.f32 %v1671_v18, %v1670_v6  ;;  %v1684_v36 = vmul.f32 %v1666_v25, %v4008_v59  ;;  %v3597_v37 = vld [vmem:[%s3963_s29 + $0x500] sm:$0xff] }
  0xe0   : > { %2299 = vmatpush.bf16.msrb.mxu3 %v3628_v32  ;;  %v3622_v32 = vld [vmem:[%s3963_s29 + $0x5c8] sm:$0xff]  ;;  %v1691_v43 = vpack.c.bf16 %v1683_v35, %v1683_v35 }
  0xe1   : > { %2261 = vmatpush.bf16.msrb.mxu0 %v3603_v41  ;;  %v1065_v11 = vpop.f32.mrf.mxu2  ;;  %v1041_v21 = vpop.f32.mrf.mxu0  ;;  %v1685_v39 = vmul.f32 %v1672_v29, %v4008_v59  ;;  %v3613_v41 = vld [vmem:[%s3963_s29 + $0x580] sm:$0xff]  ;;  %v1692_v44 = vpack.c.bf16 %v1684_v36, %v1684_v36 }
  0xe2   : > { %2274 = vmatpush.bf16.msrb.mxu1 %v3611_v42  ;;  %v1066_v12 = vadd.f32 %v1065_v11, %v1053_v8  ;;  %v1078_v13 = vpop.f32.mrf.mxu3  ;;  %v1054_v26 = vpop.f32.mrf.mxu1  ;;  %v3621_v42 = vld [vmem:[%s3963_s29 + $0x5c0] sm:$0xff] }
  0xe3   : > { %2287 = vmatpush.bf16.msrb.mxu2 %v3619_v45  ;;  %v1693_v45 = vpack.c.bf16 %v1685_v39, %v1685_v39 }
  0xe4   : > { %2300 = vmatpush.bf16.msrb.mxu3 %v3627_v46  ;;  %v1079_v20 = vadd.f32 %v1078_v13, %v1066_v12  ;;  %v1694_v46 = vpack.c.bf16 %v1686_v40, %v1686_v40  ;;  %v2313_v40 = vld [vmem:[%s208_s4] sm:$0x1] }
  0xe5   : > { %2262 = vmatpush.bf16.msrb.mxu0 %v3602_v49 }
  0xe6   : > { %2275 = vmatpush.bf16.msrb.mxu1 %v3610_v50 }
  0xe7   : > { %2288 = vmatpush.bf16.msrb.mxu2 %v3618_v53 }
  0xe8   : > { %2301 = vmatpush.bf16.msrb.mxu3 %v3626_v54 }
  0xe9   : > { %2263 = vmatpush.bf16.msrb.mxu0 %v3601_v57  ;;  %v1067_v33 = vpop.f32.mrf.mxu2 }
  0xea   : > { %2276 = vmatpush.bf16.msrb.mxu1 %v3609_v58  ;;  %v1080_v34 = vpop.f32.mrf.mxu3 }
  0xeb   : > { %2289 = vmatpush.bf16.msrb.mxu2 %v3617_v63 }
  0xec   : > { %2302 = vmatpush.bf16.msrb.mxu3 %v3625_v0 }
  0xed   : > { %2264 = vmatpush.bf16.msrb.mxu0 %v3600_v4 }
  0xee   : > { %2277 = vmatpush.bf16.msrb.mxu1 %v3608_v5 }
  0xef   : > { %2290 = vmatpush.bf16.msrb.mxu2 %v3616_v9 }
  0xf0   : > { %2303 = vmatpush.bf16.msrb.mxu3 %v3624_v10 }
  0xf1   : > { %2265 = vmatpush.bf16.msrb.mxu0 %v3599_v16 }
  0xf2   : > { %2278 = vmatpush.bf16.msrb.mxu1 %v3607_v17 }
  0xf3   : > { %2291 = vmatpush.bf16.msrb.mxu2 %v3615_v22 }
  0xf4   : > { %2304 = vmatpush.bf16.msrb.mxu3 %v3623_v23 }
  0xf5   : > { %2266 = vmatpush.bf16.msrb.mxu0 %v3598_v27 }
  0xf6   : > { %2279 = vmatpush.bf16.msrb.mxu1 %v3606_v28 }
  0xf7   : > { %2292 = vmatpush.bf16.msrb.mxu2 %v3614_v31 }
  0xf8   : > { %2305 = vmatpush.bf16.msrb.mxu3 %v3622_v32 }
  0xf9   : > { %2267 = vmatpush.bf16.msrb.mxu0 %v3597_v37  ;;  %v1091_v47 = vpop.f32.mrf.mxu0 }
  0xfa   : > { %2280 = vmatpush.bf16.msrb.mxu1 %v3605_v38  ;;  %v1092_v48 = vadd.f32 %v1091_v47, %v1079_v20  ;;  %v1104_v49 = vpop.f32.mrf.mxu1 }
  0xfb   : > { %2293 = vmatpush.bf16.msrb.mxu2 %v3613_v41 }
  0xfc   : > { %2306 = vmatpush.bf16.msrb.mxu3 %v3621_v42  ;;  %2268 = vmatmul.bf16.vlgmr.msrb.gmra.mxu0 %v1691_v43  ;;  %v1105_v59 = vadd.f32 %v1104_v49, %v1092_v48 }
  0xfd   : > { %2281 = vmatmul.bf16.vlgmr.msrb.gmra.mxu1 %v1692_v44 }
  0xfe   : > { %2294 = vmatmul.bf16.vlgmr.msrb.gmra.mxu2 %v1693_v45 }
  0xff   : > { %2307 = vmatmul.bf16.vlgmr.msrb.gmra.mxu3 %v1694_v46 }
 0x101   : > { %v1117_v50 = vpop.f32.mrf.mxu2  ;;  %v1093_v53 = vpop.f32.mrf.mxu0 }
 0x102   : > { %v1118_v51 = vadd.f32 %v1117_v50, %v1105_v59  ;;  %v1130_v52 = vpop.f32.mrf.mxu3  ;;  %v1106_v55 = vpop.f32.mrf.mxu1 }
 0x104   : > { %v1131_v54 = vadd.f32 %v1130_v52, %v1118_v51 }
 0x109   : > { %v1119_v56 = vpop.f32.mrf.mxu2 }
 0x10a   : > { %v1132_v57 = vpop.f32.mrf.mxu3 }
 0x119   : > { %v1527_v58 = vpop.f32.mrf.mxu0 }
 0x11a   : > { %v1528_v60 = vadd.f32 %v1527_v58, %v1131_v54  ;;  %v1540_v61 = vpop.f32.mrf.mxu1 }
 0x11c   : > { %v1541_v62 = vadd.f32 %v1540_v61, %v1528_v60 }
 0x121   : > { %v1553_v63 = vpop.f32.mrf.mxu2  ;;  %v1529_v2 = vpop.f32.mrf.mxu0 }
 0x122   : > { %v1554_v0 = vadd.f32 %v1553_v63, %v1541_v62  ;;  %v1566_v1 = vpop.f32.mrf.mxu3  ;;  %v1542_v4 = vpop.f32.mrf.mxu1 }
 0x124   : > { %v1567_v3 = vadd.f32 %v1566_v1, %v1554_v0 }
 0x129   : > { %v1555_v5 = vpop.f32.mrf.mxu2 }
 0x12a   : > { %v1568_v6 = vpop.f32.mrf.mxu3 }
 0x139   : > { %v1579_v7 = vpop.f32.mrf.mxu0 }
 0x13a   : > { %v1592_v8 = vpop.f32.mrf.mxu1  ;;  %v1580_v25 = vadd.f32 %v1579_v7, %v1567_v3 }
 0x13c   : > { %v1593_v30 = vadd.f32 %v1592_v8, %v1580_v25 }
 0x141   : > { %v1605_v9 = vpop.f32.mrf.mxu2  ;;  %v1581_v11 = vpop.f32.mrf.mxu0 }
 0x142   : > { %v1618_v10 = vpop.f32.mrf.mxu3  ;;  %v1594_v12 = vpop.f32.mrf.mxu1  ;;  %v1606_v31 = vadd.f32 %v1605_v9, %v1593_v30 }
 0x144   : > { %v1619_v38 = vadd.f32 %v1618_v10, %v1606_v31 }
 0x149   : > { %v1607_v13 = vpop.f32.mrf.mxu2 }
 0x14a   : > { %v1620_v14 = vpop.f32.mrf.mxu3 }
 0x159   : > { %v2217_v15 = vpop.f32.mrf.mxu0 }
 0x15a   : > { %v2230_v16 = vpop.f32.mrf.mxu1 }
 0x15b   : > { %v2231_v23 = vadd.f32 %v2230_v16, %v2217_v15 }
 0x161   : > { %v2243_v17 = vpop.f32.mrf.mxu2  ;;  %v2219_v19 = vpop.f32.mrf.mxu0 }
 0x162   : > { %v2256_v18 = vpop.f32.mrf.mxu3  ;;  %v2232_v20 = vpop.f32.mrf.mxu1  ;;  %v2244_v24 = vadd.f32 %v2243_v17, %v2231_v23 }
 0x164   : > { %v2257_v26 = vadd.f32 %v2256_v18, %v2244_v24 }
 0x169   : > { %v2245_v21 = vpop.f32.mrf.mxu2 }
 0x16a   : > { %v2258_v22 = vpop.f32.mrf.mxu3 }
 0x179   : > { %v2269_v27 = vpop.f32.mrf.mxu0 }
 0x17a   : > { %v2282_v28 = vpop.f32.mrf.mxu1  ;;  %v2270_v29 = vadd.f32 %v2269_v27, %v2257_v26 }
 0x17c   : > { %v2283_v32 = vadd.f32 %v2282_v28, %v2270_v29 }
 0x181   : > { %v2295_v33 = vpop.f32.mrf.mxu2  ;;  %v2271_v36 = vpop.f32.mrf.mxu0 }
 0x182   : > { %v2308_v34 = vpop.f32.mrf.mxu3  ;;  %v2296_v35 = vadd.f32 %v2295_v33, %v2283_v32  ;;  %v2284_v37 = vpop.f32.mrf.mxu1 }
 0x184   : > { %v2309_v39 = vadd.f32 %v2308_v34, %v2296_v35 }
 0x186   : > { %v2312_v41 = vadd.f32 %v2309_v39, %v1619_v38 }
 0x188   : > { %v2314_v42 = vadd.f32 %v2313_v40, %v2312_v41 }
 0x189   : > { %v2297_v43 = vpop.f32.mrf.mxu2 }
 0x18a   : > { %v2310_v44 = vpop.f32.mrf.mxu3  ;;  %v2315_v45 = vmax.f32 %v2314_v42, 0.0 }
 0x18c   : > { %2316 = vst [vmem:[%s236_s30] sm:$0x1] %v2315_v45 }
 0x18d PF: > { %p14_p7 = scmp.ge.s32.totalorder %s3870_s16, 6   ;;  %s4221_s12 = smov %s3813_s13 }
 0x18e   : > { %s4222_s13 = smov %s3817_s14  ;;  %s4223_s14 = smov %s3879_s19 }
 0x18f   : > { %s4224_s15 = smov %s3870_s16  ;;  %16 = sbr.rel (!%p14_p7) target bundleno = 4 (0x4), region = 92 }
 0x194   :  { %2334 = vsyncpa [#allocation3], 1 }
 0x195   :  { %2336 = vsyncpa [#allocation3 + $0x1], 1 }
 0x196   :  { %2337 = vsyncpa [#allocation5], 1 }
 0x197   :  { %2339 = vsyncpa [#allocation5 + $0x1], 1 }

</bundles_post_ra>
